<compile_context>
chip_gen: v7x
topology: tpu7x:2x2x1
jax: 0.10.0
libtpu: 0.0.40
codegen_flags: <defaults>
</compile_context>

<pallas_src>
import jax
import jax.numpy as jnp
from jax.experimental import pallas as pl
from jax.experimental.pallas import tpu as pltpu


def unit_step_kernel(x_ref, o_ref):
    x = x_ref[...]
    # heaviside(x, values=0):  x < 0 -> 0,  x == 0 -> 0,  x > 0 -> 1, NaN -> NaN
    step = jnp.where(x > 0, jnp.float32(1.0), jnp.float32(0.0))
    o_ref[...] = jnp.where(jnp.isnan(x), x, step).astype(o_ref.dtype)


def unit_step(x: jax.Array, *, block_rows: int = 512, lane_cols: int = 1024) -> jax.Array:
    """Elementwise heaviside(x, 0) for any input shape.

    The wrapper flattens the input and presents it to the kernel as a
    lane-dense (rows, lane_cols) slab (lane_cols a multiple of 128), padding
    with zeros as needed, then slices/reshapes back to the original shape.
    """
    orig_shape = x.shape
    orig_dtype = x.dtype
    n = x.size

    cols = lane_cols                       # multiple of 128 (lane axis)
    rows = pl.cdiv(n, cols)
    # Block rows: cap at block_rows, keep a multiple of 8 (sublane axis).
    br = min(block_rows, ((rows + 7) // 8) * 8)
    grid_rows = pl.cdiv(rows, br)
    rows_padded = grid_rows * br

    flat = x.reshape(-1)
    pad = rows_padded * cols - n
    if pad:
        flat = jnp.concatenate([flat, jnp.zeros((pad,), dtype=orig_dtype)])
    slab = flat.reshape(rows_padded, cols)

    out = pl.pallas_call(
        unit_step_kernel,
        out_shape=jax.ShapeDtypeStruct((rows_padded, cols), orig_dtype),
        grid=(grid_rows,),
        in_specs=[pl.BlockSpec((br, cols), lambda i: (i, 0))],
        out_specs=pl.BlockSpec((br, cols), lambda i: (i, 0)),
        compiler_params=pltpu.CompilerParams(
            dimension_semantics=("parallel",),
        ),
    )(slab)

    return out.reshape(-1)[:n].reshape(orig_shape)


def _ref_heaviside(v: jax.Array) -> jax.Array:
    s = jnp.where(v > 0, jnp.float32(1.0), jnp.float32(0.0))
    return jnp.where(jnp.isnan(v), v, s).astype(v.dtype)


if __name__ == "__main__":
    # Input consistent with the module: linspace(-50, 50, N).unsqueeze(-1),
    # at a smaller N than the original 10000.
    n = 1000
    x = jnp.linspace(-50.0, 50.0, n, dtype=jnp.float32).reshape(n, 1)

    # Additional deterministic randomized test (non-divisible length,
    # exact zeros and a NaN to exercise every branch).
    key = jax.random.PRNGKey(0)
    y = jax.random.normal(key, (257, 1), dtype=jnp.float32) * 50.0
    y = y.at[0, 0].set(0.0)
    y = y.at[100, 0].set(jnp.nan)

    out_x = jax.block_until_ready(unit_step(x))
    out_y = jax.block_until_ready(unit_step(y))

    rx = _ref_heaviside(x)
    ry = _ref_heaviside(y)

    assert out_x.shape == x.shape and out_x.dtype == x.dtype
    assert bool(jnp.all(out_x == rx))
    assert out_y.shape == y.shape and out_y.dtype == y.dtype
    # NaN-aware equality for the randomized test.
    assert bool(jnp.all(jnp.where(jnp.isnan(ry), jnp.isnan(out_y), out_y == ry)))

    print("KERNEL_OK")
</pallas_src>

<mosaic_0001>
module attributes {stable_mosaic.version = 11 : i64} {
  func.func @unit_step_kernel(%arg0: i32, %arg1: memref<8x1024xf32, #tpu.memory_space<vmem>>, %arg2: memref<8x1024xf32, #tpu.memory_space<vmem>>) attributes {dimension_semantics = [#tpu.dimension_semantics<parallel>], iteration_bounds = array<i64: 1>, scalar_prefetch = 0 : i64, scratch_operands = 0 : i64, tpu.core_type = #tpu.core_type<tc>, window_params = [{transform_indices = @transform_0, window_bounds = array<i64: 8, 1024>}, {transform_indices = @transform_1, window_bounds = array<i64: 8, 1024>}]} {
    %c0 = arith.constant 0 : index
    %c0_0 = arith.constant 0 : index
    %0 = vector.load %arg1[%c0, %c0_0] : memref<8x1024xf32, #tpu.memory_space<vmem>>, vector<8x1024xf32>
    %cst = arith.constant 0.000000e+00 : f32
    %1 = vector.broadcast %cst : f32 to vector<8x1024xf32>
    %2 = arith.cmpf ogt, %0, %1 : vector<8x1024xf32>
    %cst_1 = arith.constant 1.000000e+00 : f32
    %cst_2 = arith.constant 0.000000e+00 : f32
    %3 = vector.broadcast %cst_1 : f32 to vector<8x1024xf32>
    %4 = vector.broadcast %cst_2 : f32 to vector<8x1024xf32>
    %5 = arith.select %2, %3, %4 : vector<8x1024xi1>, vector<8x1024xf32>
    %6 = arith.cmpf one, %0, %0 : vector<8x1024xf32>
    %7 = arith.select %6, %0, %5 : vector<8x1024xi1>, vector<8x1024xf32>
    %c0_3 = arith.constant 0 : index
    %c0_4 = arith.constant 0 : index
    %8 = vector.load %arg2[%c0_3, %c0_4] : memref<8x1024xf32, #tpu.memory_space<vmem>>, vector<8x1024xf32>
    tpu.vector_store %arg2[%c0_3, %c0_4], %7 {strides = array<i32>} : memref<8x1024xf32, #tpu.memory_space<vmem>>, vector<8x1024xf32>,
    return
  }
  func.func @transform_0(%arg0: i32) -> (i32, i32) {
    %c0_i32 = arith.constant 0 : i32
    %c0_i32_0 = arith.constant 0 : i32
    return %arg0, %c0_i32 : i32, i32
  }
  func.func @transform_1(%arg0: i32) -> (i32, i32) {
    %c0_i32 = arith.constant 0 : i32
    %c0_i32_0 = arith.constant 0 : i32
    return %arg0, %c0_i32 : i32, i32
  }
}

</mosaic_0001>

<bundles_post_ra>
// kernel: tpu_custom_call.1
= control target key start
LH: loop header
LB: loop body
LE: loop exit
PB: predicated region body
PF: predicated region fallthrough
CT: control target
= control target key end

     0   :  { %6 = vsyncpa [#allocation3], 0  ;;  %s172_s0 = inlined_call_operand.hbm [shape: f32[8,1024], index: 0, kind: input, shape index: {}]   ;;  %s173_s1 = inlined_call_operand.hbm [shape: f32[8,1024], index: 1, kind: output, shape index: {}]  }
   0x1   :  { %7 = vsyncpa [#allocation4], 0  ;;  %s135_s6 = smov [#allocation2]   ;;  %s87_s10 = scalar_lea.hbm %s172_s0, 1024 }
   0x2   :  { %s14_s7 = sshll.u32 %s135_s6, 4  ;;  %p88_p0 = scmp.ne.s32.totalorder %s172_s0, %s87_s10  ;;  %s15_s7 = int_to_ptr.vmem [resolvable:$true] %s14_s7 }
   0x3   :  { %p91_p1 = scmp.lt.u32.totalorder %s87_s10, %s172_s0 }
   0x5   :  { %p93_p2 = pnand %p91_p1, %p88_p0 }
   0x7   :  { %96 = shalt.err (!%p93_p2)
}
   0x8   :  { %s97_s15 = scalar_lea.vmem %s15_s7, 1024  ;;  %p102_p4 = scmp.lt.s32.totalorder %s15_s7, %s15_s7 }
   0x9   :  { %p98_p3 = scmp.ne.s32.totalorder %s15_s7, %s97_s15  ;;  %p103_p5 = scmp.lt.s32.totalorder %s97_s15, %s97_s15 }
   0xb   :  { %p104_p6 = por %p103_p5, %p102_p4 }
   0xd   :  { %p105_p7 = pnand %p104_p6, %p98_p3 }
   0xf   :  { %108 = shalt.err (!%p105_p7)
}
  0x10   :  { %17 = dma.hbm_to_vmem [thread:$0]  %s172_s0, 1024, %s15_s7, [#allocation3]  }
  0x11   :  { %131 = dma.done.wait [#allocation3], 1024  }
  0x12   :  { %132 = vsyncadd [#allocation3], 4294966272  ;;  %v21_v0 = vld [vmem:[#allocation2] sm:$0xff]  ;;  %v22_v1 = vld [vmem:[#allocation2 + $0x8] sm:$0xff]  ;;  %v136_v5 = vmov 0.0   ;;  %s137_s0 = smov [#allocation5]  }
  0x13   :  { %v23_v2 = vld [vmem:[#allocation2 + $0x10] sm:$0xff]  ;;  %vm29_vm0 = vcmp.gt.f32.partialorder %v21_v0, 0.0  ;;  %vm45_vm1 = vcmp.ne.f32.partialorder %v21_v0, %v21_v0  ;;  %vm30_vm2 = vcmp.gt.f32.partialorder %v22_v1, 0.0  ;;  %vm46_vm3 = vcmp.ne.f32.partialorder %v22_v1, %v22_v1  ;;  %v24_v3 = vld [vmem:[#allocation2 + $0x18] sm:$0xff]  ;;  %v25_v4 = vld [vmem:[#allocation2 + $0x20] sm:$0xff]  ;;  %s75_s18 = sshll.u32 %s137_s0, 4  ;;  %s76_s18 = int_to_ptr.vmem [resolvable:$true] %s75_s18 }
  0x14   :  { %v37_v6 = vsel %vm29_vm0, 1.0, %v136_v5  ;;  %v38_v7 = vsel %vm30_vm2, 1.0, %v136_v5  ;;  %vm31_vm4 = vcmp.gt.f32.partialorder %v23_v2, 0.0  ;;  %vm47_vm5 = vcmp.ne.f32.partialorder %v23_v2, %v23_v2  ;;  %v26_v8 = vld [vmem:[#allocation2 + $0x28] sm:$0xff]  ;;  %v27_v12 = vld [vmem:[#allocation2 + $0x30] sm:$0xff]  ;;  %v28_v15 = vld [vmem:[#allocation2 + $0x38] sm:$0xff]  ;;  %p114_p9 = scmp.lt.s32.totalorder %s76_s18, %s76_s18 }
  0x15   :  { %v53_v9 = vsel %vm45_vm1, %v21_v0, %v37_v6  ;;  %v54_v10 = vsel %vm46_vm3, %v22_v1, %v38_v7  ;;  %v39_v11 = vsel %vm31_vm4, 1.0, %v136_v5  ;;  %vm32_vm6 = vcmp.gt.f32.partialorder %v24_v3, 0.0  ;;  %s109_s19 = scalar_lea.vmem %s76_s18, 1024 }
  0x16   :  { %61 = vst [vmem:[#allocation5] sm:$0xff] %v53_v9  ;;  %62 = vst [vmem:[#allocation5 + $0x8] sm:$0xff] %v54_v10  ;;  %v55_v13 = vsel %vm47_vm5, %v23_v2, %v39_v11  ;;  %v40_v14 = vsel %vm32_vm6, 1.0, %v136_v5  ;;  %vm48_vm7 = vcmp.ne.f32.partialorder %v24_v3, %v24_v3  ;;  %vm33_vm8 = vcmp.gt.f32.partialorder %v25_v4, 0.0  ;;  %p110_p8 = scmp.ne.s32.totalorder %s76_s18, %s109_s19  ;;  %p115_p10 = scmp.lt.s32.totalorder %s109_s19, %s109_s19 }
  0x17   :  { %63 = vst [vmem:[#allocation5 + $0x10] sm:$0xff] %v55_v13  ;;  %v56_v16 = vsel %vm48_vm7, %v24_v3, %v40_v14  ;;  %v41_v17 = vsel %vm33_vm8, 1.0, %v136_v5  ;;  %vm49_vm9 = vcmp.ne.f32.partialorder %v25_v4, %v25_v4  ;;  %vm34_vm10 = vcmp.gt.f32.partialorder %v26_v8, 0.0 }
  0x18   :  { %64 = vst [vmem:[#allocation5 + $0x18] sm:$0xff] %v56_v16  ;;  %v57_v18 = vsel %vm49_vm9, %v25_v4, %v41_v17  ;;  %v42_v19 = vsel %vm34_vm10, 1.0, %v136_v5  ;;  %vm50_vm11 = vcmp.ne.f32.partialorder %v26_v8, %v26_v8  ;;  %vm35_vm12 = vcmp.gt.f32.partialorder %v27_v12, 0.0  ;;  %p116_p11 = por %p115_p10, %p114_p9 }
  0x19   :  { %65 = vst [vmem:[#allocation5 + $0x20] sm:$0xff] %v57_v18  ;;  %v58_v20 = vsel %vm50_vm11, %v26_v8, %v42_v19  ;;  %v43_v21 = vsel %vm35_vm12, 1.0, %v136_v5  ;;  %vm51_vm13 = vcmp.ne.f32.partialorder %v27_v12, %v27_v12  ;;  %vm36_vm14 = vcmp.gt.f32.partialorder %v28_v15, 0.0 }
  0x1a   :  { %66 = vst [vmem:[#allocation5 + $0x28] sm:$0xff] %v58_v20  ;;  %v59_v22 = vsel %vm51_vm13, %v27_v12, %v43_v21  ;;  %v44_v23 = vsel %vm36_vm14, 1.0, %v136_v5  ;;  %vm52_vm15 = vcmp.ne.f32.partialorder %v28_v15, %v28_v15  ;;  %p117_p12 = pnand %p116_p11, %p110_p8 }
  0x1b   :  { %67 = vst [vmem:[#allocation5 + $0x30] sm:$0xff] %v59_v22  ;;  %v60_v24 = vsel %vm52_vm15, %v28_v15, %v44_v23 }
  0x1c   :  { %68 = vst [vmem:[#allocation5 + $0x38] sm:$0xff] %v60_v24 }
  0x1d   :  { %120 = shalt.err (!%p117_p12)
}
  0x1e   :  { %s121_s22 = scalar_lea.hbm %s173_s1, 1024 }
  0x1f   :  { %p122_p13 = scmp.ne.s32.totalorder %s173_s1, %s121_s22  ;;  %p125_p0 = scmp.lt.u32.totalorder %s121_s22, %s173_s1 }
  0x21   :  { %p127_p1 = pnand %p125_p0, %p122_p13 }
  0x23   :  { %130 = shalt.err (!%p127_p1)
}
  0x24   :  { %78 = dma.vmem_to_hbm [thread:$0]  %s76_s18, 1024, %s173_s1, [#allocation4]  }
  0x25   :  { %133 = dma.done.wait [#allocation4], 1024  }
  0x26   :  { %134 = vsyncadd [#allocation4], 4294966272 }
  0x27   :  { %82 = vsyncpa [#allocation3], 1 }
  0x28   :  { %83 = vsyncpa [#allocation4], 1 }

</bundles_post_ra>
